<compile_context>
chip_gen: v7x
topology: tpu7x:2x2x1
jax: 0.10.0
libtpu: 0.0.40
codegen_flags: <defaults>
</compile_context>

<pallas_src>
import jax
import jax.numpy as jnp
from jax.experimental import pallas as pl
from jax.experimental.pallas import tpu as pltpu


# --------------------------------------------------------------------------
# Kernel
# --------------------------------------------------------------------------
def _mamba_fe_kernel(x_ref, wp_ref, pool_ref, bias_ref, o_ref):
    Bt, C, L = x_ref.shape
    Lo = L // 8
    cd = wp_ref.dtype

    # One cast of x to the compute dtype (no-op on the f32 exact path; on the
    # default bf16 path this enables packed bf16 multiplies on v6e/v7x and
    # halves the temp footprint).
    x = x_ref[...].astype(cd)                                   # (Bt, C, L)

    # Three independent depthwise-conv-as-matmul passes.  The duplication /
    # second-stage pooling of the original torch.cat's is already folded into
    # pool_ref host-side, so there is no serial MXU dependency between them.
    for g in range(3):
        xw = (x * wp_ref[g]).reshape(Bt * C, L)                 # (Bt*C, L)
        yg = jnp.dot(xw, pool_ref[g],
                     preferred_element_type=jnp.float32)        # (Bt*C, Lo)
        yg = yg.reshape(Bt, C, Lo) + bias_ref[g]
        # torch.cat([y1, y2, y3], dim=1) realised as sublane-sliced stores.
        # Clean full-tile writes when C % 8 == 0; still correct otherwise
        # (masked stores), just slightly less efficient.
        o_ref[:, g * C:(g + 1) * C, :] = yg.astype(o_ref.dtype)


# --------------------------------------------------------------------------
# Host-side constant builders / heuristics
# --------------------------------------------------------------------------
def _fused_pool_matrix(L, k, dtype=jnp.float32):
    """(L, L//8) 0/1 matrix: column t sums input lanes l with
    l // k == t % (L // k).  For k == 8 this is plain block-sum pooling; for
    k == 16 / 32 it additionally realises torch.cat([y, y], dim=2) / the x4
    duplication of the original module exactly (bias is added afterwards,
    which is equivalent since the cat only duplicates values)."""
    Lo = L // 8
    rows = jnp.arange(L)[:, None] // k
    cols = jnp.arange(Lo)[None, :] % (L // k)
    return (rows == cols).astype(dtype)


def _vmem_capacity_bytes():
    """Per-TensorCore VMEM capacity; conservative 64 MiB default (v7x)."""
    try:
        info = pltpu.get_tpu_info()
        cap = getattr(info, "vmem_capacity_bytes", None)
        if cap:
            return int(cap)
    except Exception:
        pass
    return 64 * 2 ** 20


def _choose_bt(B, C, L, cb, vmem_cap):
    """Pick batches per grid step (Bt) and a possibly padded batch count.

    Targets: per-step streamed footprint under a generation-aware cap
    (8 MiB on 64 MiB-VMEM chips, 16 MiB on 128 MiB chips), >= min(4, B) grid
    steps so v7x's two TensorCores each get a pipelined >=2-step slice, and
    >= ~128 MXU rows per matmul when possible (padding B rather than
    collapsing to Bt = 1 for awkward batch sizes)."""
    block_cap = 8 * 2 ** 20 if vmem_cap <= 64 * 2 ** 20 else 16 * 2 ** 20
    # bytes per batch row per step: x dbl-buffered f32 (8*C*L) +
    # out dbl-buffered f32 (3*C*L) + compute-dtype temps (~3*C*L*cb)
    per_b = C * L * (8 + 3 + 3 * cb)
    min_steps = min(4, B)
    bt_cap = max(1, min(block_cap // per_b, B // min_steps))
    divisors = [d for d in range(1, bt_cap + 1) if B % d == 0]
    bt_div = max(divisors)
    if bt_div == bt_cap or bt_div * 3 * C >= 128:
        return bt_div, B
    # No good divisor: pad the batch so a larger Bt keeps the MXU M dim full.
    bt = bt_cap
    b_pad = ((B + bt - 1) // bt) * bt
    return bt, b_pad


def _vmem_limit(Bt, C, L, cb, vmem_cap):
    Lo = L // 8
    need = (Bt * C * L * (8 + 3 + 3 * cb)            # streamed x/out + temps
            + 2 * (3 * C * L + 3 * L * Lo) * cb      # wp + fused pools (x2)
            + 2 * 3 * C * 4                          # bias
            + 6 * Bt * C * Lo * 4)                   # f32 matmul results
    cap = min(vmem_cap * 5 // 8, 64 * 2 ** 20)       # ~40 MiB v7x, 64 MiB v5e/v6e
    return int(max(min(2 * need, cap), min(16 * 2 ** 20, cap)))


# --------------------------------------------------------------------------
# Wrapper
# --------------------------------------------------------------------------
def mamba_feature_extract(x, params, compute_dtype=jnp.bfloat16):
    """x: (B, C, L) float32, L % 32 == 0.  Returns (B, 3*C*(L//8)) float32."""
    B, C, L = x.shape
    assert L % 32 == 0, "L must be divisible by 32"
    Lo = L // 8
    w1, b1, w2, b2, w3, b3 = params
    cd = jnp.dtype(compute_dtype)
    cb = cd.itemsize

    # Per-channel conv weights tiled into lane patterns, in the compute dtype.
    wp = jnp.stack([jnp.tile(w1, (1, L // 8)),
                    jnp.tile(w2, (1, L // 16)),
                    jnp.tile(w3, (1, L // 32))], axis=0).astype(cd)         # (3,C,L)
    bias = jnp.stack([b1, b2, b3], axis=0)[:, :, None].astype(jnp.float32)  # (3,C,1)
    # Fused pool/duplication matrices (0/1 -> exact even in bf16).
    pools = jnp.stack([_fused_pool_matrix(L, 8),
                       _fused_pool_matrix(L, 16),
                       _fused_pool_matrix(L, 32)], axis=0).astype(cd)       # (3,L,Lo)

    vmem_cap = _vmem_capacity_bytes()
    Bt, B_pad = _choose_bt(B, C, L, cb, vmem_cap)
    if B_pad != B:
        x = jnp.concatenate(
            [x, jnp.zeros((B_pad - B, C, L), x.dtype)], axis=0)
    grid = (B_pad // Bt,)
    vmem_limit = _vmem_limit(Bt, C, L, cb, vmem_cap)

    out = pl.pallas_call(
        _mamba_fe_kernel,
        out_shape=jax.ShapeDtypeStruct((B_pad, 3 * C, Lo), x.dtype),
        grid=grid,
        in_specs=[
            pl.BlockSpec((Bt, C, L), lambda b: (b, 0, 0)),    # streamed input
            pl.BlockSpec((3, C, L), lambda b: (0, 0, 0)),     # wp (grid-invariant)
            pl.BlockSpec((3, L, Lo), lambda b: (0, 0, 0)),    # fused pool matrices
            pl.BlockSpec((3, C, 1), lambda b: (0, 0, 0)),     # bias
        ],
        out_specs=pl.BlockSpec((Bt, 3 * C, Lo), lambda b: (b, 0, 0)),
        compiler_params=pltpu.CompilerParams(
            dimension_semantics=("parallel",),
            vmem_limit_bytes=vmem_limit),
    )(x, wp, pools, bias)

    if B_pad != B:
        out = out[:B]
    # torch .flatten(1) of (B, 3C, Lo) == free row-major reshape.
    return out.reshape(B, 3 * C * Lo)


# --------------------------------------------------------------------------
# Init + pure-JAX reference (spec)
# --------------------------------------------------------------------------
def init_params(key, C):
    """Deterministic Conv1d-style init. Depthwise weights stored as (C, k)."""
    ks = jax.random.split(key, 6)

    def conv_init(kw, kb, k):
        bound = 1.0 / (k ** 0.5)  # fan_in = (in_channels/groups) * k = k
        w = jax.random.uniform(kw, (C, k), jnp.float32, -bound, bound)
        b = jax.random.uniform(kb, (C,), jnp.float32, -bound, bound)
        return w, b

    w1, b1 = conv_init(ks[0], ks[1], 8)
    w2, b2 = conv_init(ks[2], ks[3], 16)
    w3, b3 = conv_init(ks[4], ks[5], 32)
    return (w1, b1, w2, b2, w3, b3)


def reference(x, params):
    """Pure-JAX reference matching the PyTorch forward exactly."""
    B, C, L = x.shape
    w1, b1, w2, b2, w3, b3 = params

    def dwconv(xx, w, b, k):
        xr = xx.reshape(B, C, L // k, k)
        return jnp.einsum('bctk,ck->bct', xr, w) + b[None, :, None]

    y1 = dwconv(x, w1, b1, 8)
    y2 = dwconv(x, w2, b2, 16)
    y3 = dwconv(x, w3, b3, 32)
    y2 = jnp.concatenate([y2, y2], axis=2)
    y3 = jnp.concatenate([y3, y3, y3, y3], axis=2)
    return jnp.concatenate([y1, y2, y3], axis=1).reshape(B, -1)


if __name__ == "__main__":
    key = jax.random.PRNGKey(0)
    k_x, k_p, k_x2, k_p2 = jax.random.split(key, 4)

    # Small shapes consistent with the module: seq_len channels, L % 32 == 0.
    B, C, L = 2, 8, 64
    x = jax.random.normal(k_x, (B, C, L), dtype=jnp.float32)
    params = init_params(k_p, C)
    ref = reference(x, params)

    # Exact path: f32 MXU operands -> tight tolerance.
    out_f32 = jax.block_until_ready(
        mamba_feature_extract(x, params, compute_dtype=jnp.float32))
    assert out_f32.shape == (B, 3 * C * (L // 8)), out_f32.shape
    assert jnp.allclose(out_f32, ref, atol=1e-5, rtol=1e-5), "f32 mismatch"

    # Default fast path: bf16 weighting + bf16 MXU operands (pool matrices are
    # 0/1 so the pooling stays exact; sums accumulate in f32).
    out = jax.block_until_ready(mamba_feature_extract(x, params))
    assert out.shape == (B, 3 * C * (L // 8)), out.shape
    assert jnp.allclose(out, ref, atol=3e-2, rtol=3e-2), "bf16 mismatch"

    # Second shape exercises Bt > 1 and a 4-step parallel grid.
    B2, C2, L2 = 8, 16, 128
    x2 = jax.random.normal(k_x2, (B2, C2, L2), dtype=jnp.float32)
    params2 = init_params(k_p2, C2)
    ref2 = reference(x2, params2)
    out2 = jax.block_until_ready(mamba_feature_extract(x2, params2))
    assert out2.shape == (B2, 3 * C2 * (L2 // 8)), out2.shape
    assert jnp.allclose(out2, ref2, atol=3e-2, rtol=3e-2), "bf16 mismatch (shape 2)"

    print("KERNEL_OK")
</pallas_src>

<mosaic_0001>
module attributes {stable_mosaic.version = 11 : i64} {
  func.func @_mamba_fe_kernel(%arg0: i32, %arg1: memref<1x8x64xf32, #tpu.memory_space<vmem>>, %arg2: memref<3x8x64xf32, #tpu.memory_space<vmem>>, %arg3: memref<3x64x8xf32, #tpu.memory_space<vmem>>, %arg4: memref<3x8x1xf32, #tpu.memory_space<vmem>>, %arg5: memref<1x24x8xf32, #tpu.memory_space<vmem>>) attributes {dimension_semantics = [#tpu.dimension_semantics<parallel>], iteration_bounds = array<i64: 2>, scalar_prefetch = 0 : i64, scratch_operands = 0 : i64, tpu.core_type = #tpu.core_type<tc>, window_params = [{transform_indices = @transform_0, window_bounds = array<i64: 1, 8, 64>}, {pipeline_mode = #tpu.pipeline_mode<synchronous>, transform_indices = @transform_1, window_bounds = array<i64: 3, 8, 64>}, {pipeline_mode = #tpu.pipeline_mode<synchronous>, transform_indices = @transform_2, window_bounds = array<i64: 3, 64, 8>}, {pipeline_mode = #tpu.pipeline_mode<synchronous>, transform_indices = @transform_3, window_bounds = array<i64: 3, 8, 1>}, {transform_indices = @transform_4, window_bounds = array<i64: 1, 24, 8>}]} {
    %c0 = arith.constant 0 : index
    %c0_0 = arith.constant 0 : index
    %c0_1 = arith.constant 0 : index
    %0 = vector.load %arg1[%c0, %c0_0, %c0_1] : memref<1x8x64xf32, #tpu.memory_space<vmem>>, vector<1x8x64xf32>
    %c0_2 = arith.constant 0 : index
    %c0_3 = arith.constant 0 : index
    %c0_4 = arith.constant 0 : index
    %1 = vector.load %arg2[%c0_2, %c0_3, %c0_4] : memref<3x8x64xf32, #tpu.memory_space<vmem>>, vector<1x8x64xf32>
    %2 = vector.shape_cast %1 : vector<1x8x64xf32> to vector<8x64xf32>
    %3 = vector.shape_cast %2 : vector<8x64xf32> to vector<1x8x64xf32>
    %4 = arith.mulf %0, %3 : vector<1x8x64xf32>
    %5 = vector.shape_cast %4 : vector<1x8x64xf32> to vector<8x64xf32>
    %c0_5 = arith.constant 0 : index
    %c0_6 = arith.constant 0 : index
    %c0_7 = arith.constant 0 : index
    %6 = vector.load %arg3[%c0_5, %c0_6, %c0_7] : memref<3x64x8xf32, #tpu.memory_space<vmem>>, vector<1x64x8xf32>
    %7 = vector.shape_cast %6 : vector<1x64x8xf32> to vector<64x8xf32>
    %cst = arith.constant dense<0.000000e+00> : vector<8x8xf32>
    %8 = tpu.matmul %5, %7, %cst {dimension_numbers = #tpu.dot_dimension_numbers<[1], [0], [0], [1], [0, 0, 1, 1], [], []>} : vector<8x64xf32>, vector<64x8xf32>, vector<8x8xf32> -> vector<8x8xf32>
    %9 = vector.shape_cast %8 : vector<8x8xf32> to vector<1x8x8xf32>
    %c0_8 = arith.constant 0 : index
    %c0_9 = arith.constant 0 : index
    %c0_10 = arith.constant 0 : index
    %10 = vector.load %arg4[%c0_8, %c0_9, %c0_10] : memref<3x8x1xf32, #tpu.memory_space<vmem>>, vector<1x8x1xf32>
    %11 = vector.shape_cast %10 : vector<1x8x1xf32> to vector<8x1xf32>
    %12 = vector.shape_cast %11 : vector<8x1xf32> to vector<1x8x1xf32>
    %13 = vector.broadcast %12 : vector<1x8x1xf32> to vector<1x8x8xf32>
    %14 = arith.addf %9, %13 : vector<1x8x8xf32>
    %c0_11 = arith.constant 0 : index
    %c0_12 = arith.constant 0 : index
    %c0_13 = arith.constant 0 : index
    %15 = vector.load %arg5[%c0_11, %c0_12, %c0_13] : memref<1x24x8xf32, #tpu.memory_space<vmem>>, vector<1x8x8xf32>
    tpu.vector_store %arg5[%c0_11, %c0_12, %c0_13], %14 {strides = array<i32>} : memref<1x24x8xf32, #tpu.memory_space<vmem>>, vector<1x8x8xf32>,
    %c1 = arith.constant 1 : index
    %c0_14 = arith.constant 0 : index
    %c0_15 = arith.constant 0 : index
    %16 = vector.load %arg2[%c1, %c0_14, %c0_15] : memref<3x8x64xf32, #tpu.memory_space<vmem>>, vector<1x8x64xf32>
    %17 = vector.shape_cast %16 : vector<1x8x64xf32> to vector<8x64xf32>
    %18 = vector.shape_cast %17 : vector<8x64xf32> to vector<1x8x64xf32>
    %19 = arith.mulf %0, %18 : vector<1x8x64xf32>
    %20 = vector.shape_cast %19 : vector<1x8x64xf32> to vector<8x64xf32>
    %c1_16 = arith.constant 1 : index
    %c0_17 = arith.constant 0 : index
    %c0_18 = arith.constant 0 : index
    %21 = vector.load %arg3[%c1_16, %c0_17, %c0_18] : memref<3x64x8xf32, #tpu.memory_space<vmem>>, vector<1x64x8xf32>
    %22 = vector.shape_cast %21 : vector<1x64x8xf32> to vector<64x8xf32>
    %cst_19 = arith.constant dense<0.000000e+00> : vector<8x8xf32>
    %23 = tpu.matmul %20, %22, %cst_19 {dimension_numbers = #tpu.dot_dimension_numbers<[1], [0], [0], [1], [0, 0, 1, 1], [], []>} : vector<8x64xf32>, vector<64x8xf32>, vector<8x8xf32> -> vector<8x8xf32>
    %24 = vector.shape_cast %23 : vector<8x8xf32> to vector<1x8x8xf32>
    %c1_20 = arith.constant 1 : index
    %c0_21 = arith.constant 0 : index
    %c0_22 = arith.constant 0 : index
    %25 = vector.load %arg4[%c1_20, %c0_21, %c0_22] : memref<3x8x1xf32, #tpu.memory_space<vmem>>, vector<1x8x1xf32>
    %26 = vector.shape_cast %25 : vector<1x8x1xf32> to vector<8x1xf32>
    %27 = vector.shape_cast %26 : vector<8x1xf32> to vector<1x8x1xf32>
    %28 = vector.broadcast %27 : vector<1x8x1xf32> to vector<1x8x8xf32>
    %29 = arith.addf %24, %28 : vector<1x8x8xf32>
    %c0_23 = arith.constant 0 : index
    %c8 = arith.constant 8 : index
    %c0_24 = arith.constant 0 : index
    %30 = vector.load %arg5[%c0_23, %c8, %c0_24] : memref<1x24x8xf32, #tpu.memory_space<vmem>>, vector<1x8x8xf32>
    tpu.vector_store %arg5[%c0_23, %c8, %c0_24], %29 {strides = array<i32>} : memref<1x24x8xf32, #tpu.memory_space<vmem>>, vector<1x8x8xf32>,
    %c2 = arith.constant 2 : index
    %c0_25 = arith.constant 0 : index
    %c0_26 = arith.constant 0 : index
    %31 = vector.load %arg2[%c2, %c0_25, %c0_26] : memref<3x8x64xf32, #tpu.memory_space<vmem>>, vector<1x8x64xf32>
    %32 = vector.shape_cast %31 : vector<1x8x64xf32> to vector<8x64xf32>
    %33 = vector.shape_cast %32 : vector<8x64xf32> to vector<1x8x64xf32>
    %34 = arith.mulf %0, %33 : vector<1x8x64xf32>
    %35 = vector.shape_cast %34 : vector<1x8x64xf32> to vector<8x64xf32>
    %c2_27 = arith.constant 2 : index
    %c0_28 = arith.constant 0 : index
    %c0_29 = arith.constant 0 : index
    %36 = vector.load %arg3[%c2_27, %c0_28, %c0_29] : memref<3x64x8xf32, #tpu.memory_space<vmem>>, vector<1x64x8xf32>
    %37 = vector.shape_cast %36 : vector<1x64x8xf32> to vector<64x8xf32>
    %cst_30 = arith.constant dense<0.000000e+00> : vector<8x8xf32>
    %38 = tpu.matmul %35, %37, %cst_30 {dimension_numbers = #tpu.dot_dimension_numbers<[1], [0], [0], [1], [0, 0, 1, 1], [], []>} : vector<8x64xf32>, vector<64x8xf32>, vector<8x8xf32> -> vector<8x8xf32>
    %39 = vector.shape_cast %38 : vector<8x8xf32> to vector<1x8x8xf32>
    %c2_31 = arith.constant 2 : index
    %c0_32 = arith.constant 0 : index
    %c0_33 = arith.constant 0 : index
    %40 = vector.load %arg4[%c2_31, %c0_32, %c0_33] : memref<3x8x1xf32, #tpu.memory_space<vmem>>, vector<1x8x1xf32>
    %41 = vector.shape_cast %40 : vector<1x8x1xf32> to vector<8x1xf32>
    %42 = vector.shape_cast %41 : vector<8x1xf32> to vector<1x8x1xf32>
    %43 = vector.broadcast %42 : vector<1x8x1xf32> to vector<1x8x8xf32>
    %44 = arith.addf %39, %43 : vector<1x8x8xf32>
    %c0_34 = arith.constant 0 : index
    %c16 = arith.constant 16 : index
    %c0_35 = arith.constant 0 : index
    %45 = vector.load %arg5[%c0_34, %c16, %c0_35] : memref<1x24x8xf32, #tpu.memory_space<vmem>>, vector<1x8x8xf32>
    tpu.vector_store %arg5[%c0_34, %c16, %c0_35], %44 {strides = array<i32>} : memref<1x24x8xf32, #tpu.memory_space<vmem>>, vector<1x8x8xf32>,
    return
  }
  func.func @transform_0(%arg0: i32) -> (i32, i32, i32) {
    %c0_i32 = arith.constant 0 : i32
    %c0_i32_0 = arith.constant 0 : i32
    %c0_i32_1 = arith.constant 0 : i32
    return %arg0, %c0_i32, %c0_i32_0 : i32, i32, i32
  }
  func.func @transform_1(%arg0: i32) -> (i32, i32, i32) {
    %c0_i32 = arith.constant 0 : i32
    %c0_i32_0 = arith.constant 0 : i32
    %c0_i32_1 = arith.constant 0 : i32
    %c0_i32_2 = arith.constant 0 : i32
    return %c0_i32, %c0_i32_0, %c0_i32_1 : i32, i32, i32
  }
  func.func @transform_2(%arg0: i32) -> (i32, i32, i32) {
    %c0_i32 = arith.constant 0 : i32
    %c0_i32_0 = arith.constant 0 : i32
    %c0_i32_1 = arith.constant 0 : i32
    %c0_i32_2 = arith.constant 0 : i32
    return %c0_i32, %c0_i32_0, %c0_i32_1 : i32, i32, i32
  }
  func.func @transform_3(%arg0: i32) -> (i32, i32, i32) {
    %c0_i32 = arith.constant 0 : i32
    %c0_i32_0 = arith.constant 0 : i32
    %c0_i32_1 = arith.constant 0 : i32
    %c0_i32_2 = arith.constant 0 : i32
    return %c0_i32, %c0_i32_0, %c0_i32_1 : i32, i32, i32
  }
  func.func @transform_4(%arg0: i32) -> (i32, i32, i32) {
    %c0_i32 = arith.constant 0 : i32
    %c0_i32_0 = arith.constant 0 : i32
    %c0_i32_1 = arith.constant 0 : i32
    return %arg0, %c0_i32, %c0_i32_0 : i32, i32, i32
  }
}

</mosaic_0001>

<bundles_post_ra>
// kernel: tpu_custom_call.1
= control target key start
LH: loop header
LB: loop body
LE: loop exit
PB: predicated region body
PF: predicated region fallthrough
CT: control target
= control target key end

     0   :  { %s736_s15 = smov 0   ;;  %s865_s0 = inlined_call_operand.vmem [shape: f32[2,8,64], index: 0, kind: input, shape index: {}]   ;;  %s866_s1 = inlined_call_operand.vmem [shape: f32[3,8,64], index: 1, kind: input, shape index: {}]   ;;  %s867_s2 = inlined_call_operand.vmem [shape: f32[3,64,8], index: 2, kind: input, shape index: {}]   ;;  %s868_s3 = inlined_call_operand.vmem [shape: f32[3,8,1], index: 3, kind: input, shape index: {}]   ;;  %s869_s4 = inlined_call_operand.vmem [shape: f32[2,24,8], index: 4, kind: output, shape index: {}]  }
   0x1 LB: > { %s532_s16 = sadd.s32 4294967295, %s705_s15   ;;  %p536_p0 = scmp.ge.s32.totalorder %s705_s15, 1  ;;  %s705_s15 = sphi %s736_s15, %s14_s15  }
   0x2   : > { %p161_p1 = scmp.lt.s32.totalorder %s705_s15, 3 }
   0x4   : > { %p162_p2 = pnand %p536_p0, %p161_p1 }
   0x5   : > { %v198_v0 = vld [vmem:[%s867_s2] sm:$0xff] (!%p162_p2)  ;;  %v199_v1 = vld [vmem:[%s867_s2 + $0x8] sm:$0xff] (!%p162_p2)  ;;  %v200_v2 = vld [vmem:[%s867_s2 + $0x10] sm:$0xff] (!%p162_p2)  ;;  %v707_v3 = vmov (!%p162_p2), 0.0|0.0   ;;  %p186_p3 = scmp.lt.s32.totalorder (!%p162_p2), %s532_s16, 1  ;;  %vm708_vm0 = vmmov (!%p162_p2), 0  }
   0x6   : > { %165 = sbr.rel (%p162_p2) target bundleno = 254 (0xfe), region = 36  ;;  %648 = vmatprep.subr.bf16.mxu0 (!%p162_p2), %v707_v3  ;;  %v649_v4 = vpack.c.bf16 (!%p162_p2), %v199_v1, %v198_v0  ;;  %v201_v5 = vld [vmem:[%s867_s2 + $0x18] sm:$0xff] (!%p162_p2)  ;;  %660 = vmatprep.subr.bf16.mxu1 (!%p162_p2), %v707_v3  ;;  %v541_v6 = vld [vmem:[%s867_s2 + $0x40] sm:$0xff] (!%p162_p2)  ;;  %v709_v7 = vmov (!%p162_p2), 0.0   ;;  %v542_v9 = vld [vmem:[%s867_s2 + $0x48] sm:$0xff] (!%p162_p2)  ;;  %v710_v11 = vmov (!%p162_p2), 0  }
   0x7   : > { %607 = vmatprep.mubr.msk.f32.mxu0 (!%p162_p2), %vm708_vm0, %v709_v7  ;;  %626 = vmatprep.mubr.msk.f32.mxu1 (!%p162_p2), %vm708_vm0, %v709_v7  ;;  %v652_v8 = vpack.c.bf16 (!%p162_p2), %v201_v5, %v200_v2  ;;  %v543_v10 = vld [vmem:[%s867_s2 + $0x50] sm:$0xff] (!%p162_p2)  ;;  %v202_v12 = vld [vmem:[%s867_s2 + $0x20] sm:$0xff] (!%p162_p2)  ;;  %v203_v13 = vld [vmem:[%s867_s2 + $0x28] sm:$0xff] (!%p162_p2)  ;;  %v661_v14 = vpack.c.bf16 (!%p162_p2), %v542_v9, %v541_v6  ;;  %vm206_vm1 = vcmask (!%p162_p2), 523264   ;;  %vm287_vm2 = vcmask (!%p162_p2), 64512  }
   0x8   : > { %650 = vmatpush3.bf16.msra.mxu0 (!%p162_p2), %v649_v4  ;;  %697 = vset.pattern.permute.xlu0 (!%p162_p2), %v710_v11  ;;  %v544_v15 = vld [vmem:[%s867_s2 + $0x58] sm:$0xff] (!%p162_p2)  ;;  %v655_v17 = vpack.c.bf16 (!%p162_p2), %v203_v13, %v202_v12  ;;  %v545_v18 = vld [vmem:[%s867_s2 + $0x60] sm:$0xff] (!%p162_p2)  ;;  %v546_v19 = vld [vmem:[%s867_s2 + $0x68] sm:$0xff] (!%p162_p2) }
   0x9   : > { %651 = vmatprep.subr.bf16.mxu0 (!%p162_p2), %v707_v3  ;;  %698 = vset.pattern.permute.xlu1 (!%p162_p2), %v710_v11  ;;  %v664_v16 = vpack.c.bf16 (!%p162_p2), %v544_v15, %v543_v10  ;;  %v204_v20 = vld [vmem:[%s867_s2 + $0x30] sm:$0xff] (!%p162_p2)  ;;  %v205_v21 = vld [vmem:[%s867_s2 + $0x38] sm:$0xff] (!%p162_p2)  ;;  %v280_v22 = vld [vmem:[%s868_s3] sm:$0xff] (!%p162_p2)  ;;  %v667_v24 = vpack.c.bf16 (!%p162_p2), %v546_v19, %v545_v18 }
   0xa   : > { %662 = vmatpush3.bf16.msra.mxu1 (!%p162_p2), %v661_v14  ;;  %v196_v23 = vld [vmem:[%s866_s1] sm:$0xff] (!%p162_p2)  ;;  %v547_v25 = vld [vmem:[%s867_s2 + $0x70] sm:$0xff] (!%p162_p2)  ;;  %283 = vperm.xlu0 (!%p162_p2), %697, %v280_v22   ;;  %v658_v27 = vpack.c.bf16 (!%p162_p2), %v205_v21, %v204_v20  ;;  %v548_v29 = vld [vmem:[%s867_s2 + $0x78] sm:$0xff] (!%p162_p2) }
   0xb   : > { %663 = vmatprep.subr.bf16.mxu1 (!%p162_p2), %v707_v3  ;;  %v561_v26 = vld [vmem:[%s868_s3 + $0x10] sm:$0xff] (!%p162_p2)  ;;  %v550_v30 = vld [vmem:[%s868_s3 + $0x8] sm:$0xff] (!%p162_p2)  ;;  %v552_v31 = vld [vmem:[%s867_s2 + $0x80] sm:$0xff] (!%p162_p2)  ;;  %v670_v34 = vpack.c.bf16 (!%p162_p2), %v548_v29, %v547_v25 }
   0xc   : > { %653 = vmatpush3.bf16.msra.mxu0 (!%p162_p2), %v652_v8  ;;  %v553_v32 = vld [vmem:[%s867_s2 + $0x88] sm:$0xff] (!%p162_p2)  ;;  %472 = vperm.xlu1 (!%p162_p2), %698, %v561_v26   ;;  %v554_v37 = vld [vmem:[%s867_s2 + $0x90] sm:$0xff] (!%p162_p2)  ;;  %v555_v38 = vld [vmem:[%s867_s2 + $0x98] sm:$0xff] (!%p162_p2) }
   0xd   : > { %s871_s16 = smov (!%p186_p3, %s532_s16), 1  ;;  %654 = vmatprep.subr.bf16.mxu0 %v707_v3  ;;  %v540_v35 = vld [vmem:[%s866_s1 + $0x8] sm:$0xff]  ;;  %v673_v36 = vpack.c.bf16 %v553_v32, %v552_v31  ;;  %v676_v40 = vpack.c.bf16 %v555_v38, %v554_v37  ;;  %v556_v41 = vld [vmem:[%s867_s2 + $0xa0] sm:$0xff]  ;;  %v558_v44 = vld [vmem:[%s867_s2 + $0xb0] sm:$0xff] }
   0xe   : > { %s537_s11 = sshll.u32 %s871_s16, 3  ;;  %665 = vmatpush3.bf16.msra.mxu1 %v664_v16  ;;  %378 = vperm.xlu0 %697, %v550_v30   ;;  %v557_v42 = vld [vmem:[%s867_s2 + $0xa8] sm:$0xff]  ;;  %v559_v45 = vld [vmem:[%s867_s2 + $0xb8] sm:$0xff]  ;;  %v551_v47 = vld [vmem:[%s866_s1 + $0x10] sm:$0xff]  ;;  %s684_s7 = smul.u32 24, %s871_s16 }
   0xf   : > { %s189_s24 = scalar_lea.vmem %s865_s0, %s537_s11  ;;  %666 = vmatprep.subr.bf16.mxu1 %v707_v3  ;;  %v679_v43 = vpack.c.bf16 %v557_v42, %v556_v41  ;;  %v682_v46 = vpack.c.bf16 %v559_v45, %v558_v44 }
  0x10   : > { %656 = vmatpush3.bf16.msra.mxu0 %v655_v17  ;;  %v195_v28 = vld [vmem:[%s189_s24] sm:$0xff]  ;;  %s194_s10 = scalar_lea.vmem %s869_s4, %s684_s7 }
  0x11   : > { %657 = vmatprep.subr.bf16.mxu0 %v707_v3  ;;  %v197_v33 = vmul.f32 %v196_v23, %v195_v28  ;;  %v291_v39 = vmul.f32 %v540_v35, %v195_v28  ;;  %v385_v48 = vmul.f32 %v551_v47, %v195_v28 }
  0x12   : > { %668 = vmatpush3.bf16.msra.mxu1 %v667_v24 }
  0x13   : > { %669 = vmatprep.subr.bf16.mxu1 %v707_v3 }
  0x14   : > { %659 = vmatpush3.bf16.msra.mxu0 %v658_v27 }
  0x15   : > { %672 = vmatprep.subr.bf16.mxu0 %v707_v3 }
  0x16   : > { %671 = vmatpush3.bf16.msra.mxu1 %v670_v34 }
  0x17   : > { %608 = vmatmul.mubr.msk.f32.vlgmr.msra.gmra.mrb[0].mxu0 %vm206_vm1, %v197_v33 }
  0x18   : > { %674 = vmatpush3.bf16.msra.mxu0 %v673_v36  ;;  %645 = vmatprep.mubr.msk.f32.mxu0 %vm708_vm0, %v709_v7 }
  0x19   : > { %675 = vmatprep.subr.bf16.mxu0 %v707_v3  ;;  %627 = vmatmul.mubr.msk.f32.vlgmr.msra.gmra.mrb[0].mxu1 %vm206_vm1, %v291_v39 }
  0x1c   : > { %677 = vmatpush3.bf16.msra.mxu0 %v676_v40 }
  0x1d   : > { %678 = vmatprep.subr.bf16.mxu0 %v707_v3 }
  0x20   : > { %680 = vmatpush3.bf16.msra.mxu0 %v679_v43 }
  0x21   : > { %681 = vmatprep.subr.bf16.mxu0 %v707_v3 }
  0x24   : > { %683 = vmatpush3.bf16.msra.mxu0 %v682_v46 }
  0x27   : > { %646 = vmatmul.mubr.msk.f32.vlgmr.msra.gmra.mrb[2].mxu0 %vm206_vm1, %v385_v48 }
  0x89   : > { %v284_v49 = vpop.permute.xlu0 %283 }
  0x8b   : > { %v473_v57 = vpop.permute.xlu1 %472 }
  0x8d   : > { %v379_v53 = vpop.permute.xlu0 %378 }
  0xea   : > { %v276_v50 = vpop.f32.mrb[0].mxu0 }
  0xeb   : > { %v286_v51 = vadd.f32 %v284_v49, %v276_v50  ;;  %v609_v52 = vpop.f32.mrb[1].mxu0 }
  0xec   : > { %v370_v54 = vpop.f32.mrb[0].mxu1 }
  0xed   : > { %288 = vst.msk [vmem:[%s194_s10] sm:$0xff] %vm287_vm2, %v286_v51  ;;  %v381_v55 = vadd.f32 %v379_v53, %v370_v54  ;;  %v628_v56 = vpop.f32.mrb[1].mxu1 }
  0xef   : > { %382 = vst.msk [vmem:[%s194_s10 + $0x8] sm:$0xff] %vm287_vm2, %v381_v55 }
  0xfa   : > { %v464_v58 = vpop.f32.mrb[2].mxu0 }
  0xfb   : > { %v475_v59 = vadd.f32 %v473_v57, %v464_v58  ;;  %v647_v60 = vpop.f32.mrb[3].mxu0 }
  0xfd   : > { %476 = vst.msk [vmem:[%s194_s10 + $0x10] sm:$0xff] %vm287_vm2, %v475_v59 }
  0xfe PF: > { %s14_s15 = sadd.s32 1, %s705_s15  }
  0xff   : > { %p11_p4 = scmp.ge.s32.totalorder %s14_s15, 4  }
 0x101   :  { %13 = sbr.rel (!%p11_p4) target bundleno = 1 (0x1), region = 72 }

</bundles_post_ra>
